<compile_context>
chip_gen: v7x
topology: tpu7x:2x2x1
jax: 0.10.0
libtpu: 0.0.40
codegen_flags: <defaults>
</compile_context>

<pallas_src>
import functools

import jax
import jax.numpy as jnp
from jax.experimental import pallas as pl
from jax.experimental.pallas import tpu as pltpu

LANE = 128          # TPU lane width; pad class dim to this for lane-dense stores
FEAT_DIM = 1280     # fixed by LinearClassifier.__init__
NUM_CLASSES = 10    # fixed by LinearClassifier.__init__


def _round_up(x: int, m: int) -> int:
    return (x + m - 1) // m * m


def prepare_params(weight, bias, compute_dtype=jnp.bfloat16):
    """One-time conversion of PyTorch-layout params.

    weight: [C, D] f32 (PyTorch nn.Linear layout), bias: [C] f32.
    Returns (w_padded [D, Cp] compute_dtype, b_padded [1, Cp] f32), Cp = 128.
    """
    C, D = weight.shape
    Cp = _round_up(C, LANE)
    w_padded = jnp.zeros((D, Cp), compute_dtype)
    w_padded = w_padded.at[:, :C].set(weight.T.astype(compute_dtype))
    b_padded = jnp.zeros((1, Cp), jnp.float32)
    b_padded = b_padded.at[:, :C].set(bias.astype(jnp.float32))
    return w_padded, b_padded


def linear_kernel(x_ref, w_ref, b_ref, o_ref):
    # x_ref: [TB, D] f32, w_ref: [D, Cp] bf16 (resident), b_ref: [1, Cp] f32,
    # o_ref: [TB, Cp] f32.  Cast f32 -> bf16 in-kernel (hides under the DMA).
    x = x_ref[...].astype(w_ref.dtype)
    acc = jnp.dot(x, w_ref[...], preferred_element_type=jnp.float32)
    o_ref[...] = (acc + b_ref[...]).astype(o_ref.dtype)


@functools.partial(jax.jit, static_argnames=("num_classes", "block_b"))
def linear_classifier(features, w_padded, b_padded, *, num_classes=NUM_CLASSES,
                      block_b=1024):
    """features: [B, D] f32; w_padded/b_padded from prepare_params. Returns [B, C] f32."""
    B, D = features.shape
    Cp = w_padded.shape[1]

    # Batch tile: multiple of 8 (sublane).  For B <= block_b pick ~B/2 so the
    # grid has >= 2 steps (lets v7x split the "parallel" axis across its two
    # TensorCores); otherwise cap at block_b (mem-bound sweet spot, VMEM-safe
    # on all generations with f32 input blocks double-buffered).
    if B <= block_b:
        TB = max(8, _round_up(pl.cdiv(B, 2), 8))
    else:
        TB = block_b

    grid = (pl.cdiv(B, TB),)  # partial last block handled by Pallas masking

    out = pl.pallas_call(
        linear_kernel,
        out_shape=jax.ShapeDtypeStruct((B, Cp), jnp.float32),
        grid_spec=pltpu.PrefetchScalarGridSpec(
            num_scalar_prefetch=0,
            grid=grid,
            in_specs=[
                # x tile marches over the batch; weight/bias stay VMEM-resident
                # (index_map returns the same block -> no re-DMA).
                pl.BlockSpec((TB, D), lambda i: (i, 0)),
                pl.BlockSpec((D, Cp), lambda i: (0, 0)),
                pl.BlockSpec((1, Cp), lambda i: (0, 0)),
            ],
            out_specs=pl.BlockSpec((TB, Cp), lambda i: (i, 0)),
        ),
        compiler_params=pltpu.CompilerParams(
            # Batch axis is independent -> shardable across v7x's 2 TensorCores.
            dimension_semantics=("parallel",),
        ),
        cost_estimate=pl.CostEstimate(
            flops=2 * B * D * Cp,
            transcendentals=0,
            # f32 activations read directly by the kernel (no wrapper cast pass).
            bytes_accessed=B * D * 4 + D * Cp * 2 + Cp * 4 + B * Cp * 4,
        ),
    )(features, w_padded, b_padded)

    # Slice the real classes outside the kernel (keep the lane-dense 128-wide
    # store inside).  Downstream consumers that can take the padded slab
    # directly should skip this slice.
    return out[:, :num_classes]


if __name__ == "__main__":
    batch = 10  # small example batch; deliberately not a multiple of 8 to
                # exercise the partial-last-block path (grid = 2 steps of TB=8)

    key = jax.random.PRNGKey(0)
    k_x, k_w, k_b = jax.random.split(key, 3)

    # PyTorch nn.Linear init: U(-1/sqrt(D), 1/sqrt(D)).
    bound = 1.0 / (FEAT_DIM ** 0.5)
    weight = jax.random.uniform(k_w, (NUM_CLASSES, FEAT_DIM), jnp.float32, -bound, bound)
    bias = jax.random.uniform(k_b, (NUM_CLASSES,), jnp.float32, -bound, bound)
    features = jax.random.normal(k_x, (batch, FEAT_DIM), jnp.float32)

    # One-time param prep (done outside the hot path).
    w_padded, b_padded = prepare_params(weight, bias)

    out = linear_classifier(features, w_padded, b_padded)
    out = jax.block_until_ready(out)
    assert out.shape == (batch, NUM_CLASSES)

    # Reference with matching bf16 rounding + f32 accumulation.
    x_bf = features.astype(jnp.bfloat16).astype(jnp.float32)
    w_bf = weight.astype(jnp.bfloat16).astype(jnp.float32)
    ref_bf16 = x_bf @ w_bf.T + bias
    assert jnp.allclose(out, ref_bf16, atol=1e-3, rtol=1e-3)

    # Loose check against the pure-f32 PyTorch semantics.
    ref_f32 = features @ weight.T + bias
    assert jnp.allclose(out, ref_f32, atol=5e-2, rtol=5e-2)

    print("KERNEL_OK")
</pallas_src>

<mosaic_0001>
module attributes {stable_mosaic.version = 11 : i64} {
  func.func @linear_kernel(%arg0: i32, %arg1: memref<8x1280xf32, #tpu.memory_space<vmem>>, %arg2: memref<1280x128xbf16, #tpu.memory_space<vmem>>, %arg3: memref<1x128xf32, #tpu.memory_space<vmem>>, %arg4: memref<8x128xf32, #tpu.memory_space<vmem>>) attributes {dimension_semantics = [#tpu.dimension_semantics<parallel>], iteration_bounds = array<i64: 2>, scalar_prefetch = 0 : i64, scratch_operands = 0 : i64, tpu.core_type = #tpu.core_type<tc>, window_params = [{transform_indices = @transform_0, window_bounds = array<i64: 8, 1280>}, {pipeline_mode = #tpu.pipeline_mode<synchronous>, transform_indices = @transform_1, window_bounds = array<i64: 1280, 128>}, {pipeline_mode = #tpu.pipeline_mode<synchronous>, transform_indices = @transform_2, window_bounds = array<i64: 1, 128>}, {transform_indices = @transform_3, window_bounds = array<i64: 8, 128>}]} {
    %c0 = arith.constant 0 : index
    %c0_0 = arith.constant 0 : index
    %0 = vector.load %arg1[%c0, %c0_0] : memref<8x1280xf32, #tpu.memory_space<vmem>>, vector<8x1280xf32>
    %1 = arith.truncf %0 : vector<8x1280xf32> to vector<8x1280xbf16>
    %c0_1 = arith.constant 0 : index
    %c0_2 = arith.constant 0 : index
    %2 = vector.load %arg2[%c0_1, %c0_2] : memref<1280x128xbf16, #tpu.memory_space<vmem>>, vector<1280x128xbf16>
    %cst = arith.constant dense<0.000000e+00> : vector<8x128xf32>
    %3 = tpu.matmul %1, %2, %cst {dimension_numbers = #tpu.dot_dimension_numbers<[1], [0], [0], [1], [0, 0, 1, 1], [], []>} : vector<8x1280xbf16>, vector<1280x128xbf16>, vector<8x128xf32> -> vector<8x128xf32>
    %c0_3 = arith.constant 0 : index
    %c0_4 = arith.constant 0 : index
    %4 = vector.load %arg3[%c0_3, %c0_4] : memref<1x128xf32, #tpu.memory_space<vmem>>, vector<1x128xf32>
    %5 = vector.broadcast %4 : vector<1x128xf32> to vector<8x128xf32>
    %6 = arith.addf %3, %5 : vector<8x128xf32>
    %c0_5 = arith.constant 0 : index
    %c0_6 = arith.constant 0 : index
    %7 = vector.load %arg4[%c0_5, %c0_6] : memref<8x128xf32, #tpu.memory_space<vmem>>, vector<8x128xf32>
    tpu.vector_store %arg4[%c0_5, %c0_6], %6 {strides = array<i32>} : memref<8x128xf32, #tpu.memory_space<vmem>>, vector<8x128xf32>,
    return
  }
  func.func @transform_0(%arg0: i32) -> (i32, i32) {
    %c0_i32 = arith.constant 0 : i32
    %c0_i32_0 = arith.constant 0 : i32
    return %arg0, %c0_i32 : i32, i32
  }
  func.func @transform_1(%arg0: i32) -> (i32, i32) {
    %c0_i32 = arith.constant 0 : i32
    %c0_i32_0 = arith.constant 0 : i32
    %c0_i32_1 = arith.constant 0 : i32
    return %c0_i32, %c0_i32_0 : i32, i32
  }
  func.func @transform_2(%arg0: i32) -> (i32, i32) {
    %c0_i32 = arith.constant 0 : i32
    %c0_i32_0 = arith.constant 0 : i32
    %c0_i32_1 = arith.constant 0 : i32
    return %c0_i32, %c0_i32_0 : i32, i32
  }
  func.func @transform_3(%arg0: i32) -> (i32, i32) {
    %c0_i32 = arith.constant 0 : i32
    %c0_i32_0 = arith.constant 0 : i32
    return %arg0, %c0_i32 : i32, i32
  }
}

</mosaic_0001>

<bundles_post_ra>
// kernel: linear_classifier.1
= control target key start
LH: loop header
LB: loop body
LE: loop exit
PB: predicated region body
PF: predicated region fallthrough
CT: control target
= control target key end

     0   :  { %8 = vsyncpa [#allocation3], 0  ;;  %s1877_s0 = inlined_call_operand.hbm [shape: f32[10,1280], index: 0, kind: input, shape index: {}]   ;;  %s1878_s1 = inlined_call_operand.hbm [shape: bf16[1280,128], index: 1, kind: input, shape index: {}]   ;;  %s1879_s2 = inlined_call_operand.vmem [shape: f32[1,128], index: 2, kind: input, shape index: {}]   ;;  %s1880_s3 = inlined_call_operand.hbm [shape: f32[10,128], index: 3, kind: output, shape index: {}]  }
   0x1   :  { %10 = vsyncpa [#allocation3 + $0x1], 0 }
   0x2   :  { %11 = vsyncpa [#allocation6], 0 }
   0x3   :  { %12 = vsyncpa [#allocation4], 0 }
   0x4   :  { %14 = vsyncpa [#allocation4 + $0x1], 0  ;;  %s1665_s12 = smov 0   ;;  %s1667_s13 = smov 0  }
   0x5   :  { %s1669_s14 = smov 0   ;;  %s1671_s15 = smov 0  }
   0x6 LB: > { %s1686_s16 = sadd.s32 4294967295, %s1638_s15   ;;  %s1165_s17 = sadd.s32 4294967294, %s1638_s15   ;;  %s1638_s15 = sphi %s1671_s15, %s1900_s15   ;;  %s1634_s14 = sphi %s1669_s14, %s1899_s14   ;;  %s1630_s13 = sphi %s1667_s13, %s1898_s13   ;;  %s1626_s12 = sphi %s1665_s12, %s1897_s12  }
   0x7   : > { %p40_p0 = scmp.ne.s32.totalorder %s1630_s13, %s1626_s12  ;;  %p1881_p1 = scmp.eq.s32.totalorder %s1686_s16, 0 }
   0x8   : > { %p112_p3 = scmp.eq.s32.totalorder %s1165_s17, 1  ;;  %p1166_p5 = scmp.ge.s32.totalorder %s1638_s15, 1 }
   0x9   : > { %p1695_p4 = por %p1881_p1, %p40_p0  ;;  %p119_p7 = scmp.lt.s32.totalorder %s1638_s15, 3 }
   0xa   : > { %p1700_p6 = por %p112_p3, %p40_p0  ;;  %s1640_s21 = smov [#allocation5]  }
   0xb   : > { %s1884_s18 = scalar_select %p1695_p4, 1, 0 }
   0xc   : > { %s1885_s19 = scalar_select %p1700_p6, 1, 0 }
   0xd   : > { %p1705_p8 = pnand %p1166_p5, %p119_p7  ;;  %s131_s22 = sshll.u32 %s1640_s21, 4  ;;  %s1709_s22 = int_to_ptr.vmem [resolvable:$true] %s131_s22 }
   0xe   : > { %s1721_s24 = sadd.s32 1, %s1638_s15   ;;  %s27_s25 = sadd.s32 1, %s1634_s14 }
   0xf   : > { %s1886_s20 = scalar_select %p1705_p8, 1, 0 }
  0x10   : > { %p1379_p9 = pneg %p1705_p8  ;;  %s24_s26 = ssub.s32 %s1638_s15, %s1721_s24 }
  0x11   : > { %s1510_s29 = scalar_lea.hbm %s1878_s1, 10240 }
  0x12   : > { %p1716_p11 = pnand %p1379_p9, %p1881_p1  ;;  %p1511_p12 = scmp.ne.s32.totalorder %s1878_s1, %s1510_s29 }
  0x13   : > { %p1517_p5 = scmp.lt.u32.totalorder %s1510_s29, %s1878_s1 }
  0x14   : > { %p1512_p13 = pneg %p1716_p11 }
  0x16   : > { %p1513_p0 = pnand %p1512_p13, %p1511_p12 }
  0x18   : > { %p1514_p3 = pneg %p1513_p0 }
  0x1a   : > { %p1519_p7 = pnand %p1517_p5, %p1514_p3 }
  0x1c   : > { %1522 = shalt.err (!%p1519_p7)
}
  0x1d   : > { %s1523_s7 = scalar_lea.vmem %s1709_s22, 10240  ;;  %p1531_p2 = scmp.lt.s32.totalorder %s1709_s22, %s1709_s22 }
  0x1e   : > { %p1524_p9 = scmp.ne.s32.totalorder %s1709_s22, %s1523_s7  ;;  %p1532_p6 = scmp.lt.s32.totalorder %s1523_s7, %s1523_s7 }
  0x20   : > { %p1526_p10 = pnand %p1524_p9, %p1512_p13  ;;  %p1533_p4 = por %p1532_p6, %p1531_p2 }
  0x22   : > { %p1527_p1 = pneg %p1526_p10 }
  0x24   : > { %p1534_p8 = pnand %p1533_p4, %p1527_p1 }
  0x26   : > { %1537 = shalt.err (!%p1534_p8)
}
  0x27   : > { %s1641_s8 = smov 64   ;;  %s1642_s9 = smov 4  }
  0x28   : > { %1382 = dma.hbm_to_vmem [thread:$0]  (!%p1716_p11), %s1878_s1, 10240, %s1709_s22, [#allocation6], %s1641_s8, %s1641_s8, %s1642_s9  }
  0x29   : > { %p25_p2 = scmp.eq.s32.totalorder %s24_s26, 0  ;;  %p34_p1 = scmp.ne.s32.totalorder %s1634_s14, %s1630_s13 }
  0x2a   : > { %p35_p4 = scmp.eq.s32.totalorder %s1638_s15, 0  ;;  %p1392_p6 = scmp.lt.s32.totalorder %s1638_s15, 2 }
  0x2b   : > { %s1752_s17 = scalar_select %p25_p2, %s1634_s14, %s27_s25  }
  0x2c   : > { %p36_p8 = por %p35_p4, %p34_p1  ;;  %p1888_p10 = scmp.eq.s32.totalorder %s1686_s16, 1 }
  0x2d   : > { %s148_s27 = sand.u32 1, %s1634_s14   ;;  %s1369_s28 = smul.u32 1280, %s1638_s15 }
  0x2e   : > { %p1756_p12 = por %p1888_p10, %p34_p1  ;;  %s1368_s29 = smul.u32 80, %s148_s27 }
  0x2f   : > { %p1762_p13 = pnand %p1392_p6, %p36_p8  ;;  %s1769_s25 = scalar_lea.hbm %s1877_s0, %s1369_s28 }
  0x30   : > { %s152_s30 = scalar_lea.vmem [#allocation2], %s1368_s29  ;;  %s149_s5 = scalar_lea.sflag [#allocation3], %s148_s27 }
  0x31   : > { %s160_s4 = sshll.u32 %s152_s30, 4  ;;  %s1538_s6 = scalar_lea.hbm %s1769_s25, 1280  ;;  %s1771_s4 = int_to_ptr.vmem [resolvable:$true] %s160_s4 }
  0x32   : > { %p1539_p11 = scmp.ne.s32.totalorder %s1769_s25, %s1538_s6  ;;  %p1540_p0 = pneg %p1762_p13 }
  0x33   : > { %s1543_s9 = scalar_lea.hbm %s1877_s0, 2560  ;;  %p1544_p7 = scmp.lt.u32.totalorder %s1769_s25, %s1877_s0 }
  0x34   : > { %p1541_p3 = pnand %p1540_p0, %p1539_p11  ;;  %p1545_p9 = scmp.lt.u32.totalorder %s1543_s9, %s1538_s6 }
  0x35   : > { %p1547_p1 = scmp.lt.u32.totalorder %s1538_s6, %s1769_s25 }
  0x36   : > { %p1542_p5 = pneg %p1541_p3  ;;  %p1546_p2 = por %p1545_p9, %p1544_p7 }
  0x38   : > { %p1548_p4 = por %p1547_p1, %p1546_p2 }
  0x3a   : > { %p1549_p6 = pnand %p1548_p4, %p1542_p5 }
  0x3c   : > { %1552 = shalt.err (!%p1549_p6)
}
  0x3d   : > { %s1553_s27 = scalar_lea.vmem %s1771_s4, 1280  ;;  %s1643_s28 = smov [#allocation2]  }
  0x3e   : > { %p1554_p8 = scmp.ne.s32.totalorder %s1771_s4, %s1553_s27  ;;  %s1558_s29 = sshll.u32 %s1643_s28, 4  ;;  %s1559_s29 = int_to_ptr.vmem [resolvable:$false] %s1558_s29 }
  0x3f   : > { %s1560_s22 = scalar_lea.vmem %s1559_s29, 2560  ;;  %p1561_p3 = scmp.lt.s32.totalorder %s1771_s4, %s1559_s29 }
  0x40   : > { %p1556_p10 = pnand %p1554_p8, %p1540_p0  ;;  %p1562_p7 = scmp.lt.s32.totalorder %s1560_s22, %s1553_s27 }
  0x42   : > { %p1557_p11 = pneg %p1556_p10  ;;  %p1563_p9 = por %p1562_p7, %p1561_p3 }
  0x44   : > { %p1564_p2 = pnand %p1563_p9, %p1557_p11 }
  0x46   : > { %1567 = shalt.err (!%p1564_p2)
}
  0x47   : > { %1386 = dma.hbm_to_vmem [thread:$0]  (!%p1762_p13), %s1769_s25, 1280, %s1771_s4, %s149_s5  }
  0x48   : > { %p1891_p5 = scmp.ne.s32.totalorder %s1886_s20, 0 }
  0x49   : > { %s1801_s26 = sand.u32 (!%p1891_p5), 1, %s1630_s13   ;;  %p1892_p0 = scmp.ne.s32.totalorder (!%p1891_p5), %s1884_s18, 0 }
  0x4a   : > { %169 = sbr.rel (%p1891_p5) target bundleno = 413 (0x19d), region = 32  ;;  %s172_s6 = scalar_lea.sflag (!%p1891_p5), [#allocation3], %s1801_s26 }
  0x4b   : > { %s1370_s30 = smul.u32 (!%p1891_p5), 80, %s1801_s26 }
  0x4d   : > { %s1805_s7 = scalar_lea.vmem (!%p1891_p5), [#allocation2], %s1370_s30 }
  0x51   : > { %1613 = dma.done.wait (%p1892_p0), %s172_s6, 1280  }
  0x52   : > { %1615 = vsyncadd (%p1892_p0), %s172_s6, 4294966016  ;;  %p1893_p13 = scmp.eq.s32.totalorder %s1686_s16, 0 }
  0x54   : > { %1617 = dma.done.wait (%p1893_p13), [#allocation6], 10240   ;;  %p1894_p1 = pmov %p1893_p13 }
  0x55   : > { %v1430_v0 = vld [vmem:[#allocation5 + $0x40] sm:$0xff]   ;;  %v1434_v4 = vld [vmem:[#allocation5 + $0x48] sm:$0xff]   ;;  %v1438_v8 = vld [vmem:[#allocation5 + $0x50] sm:$0xff]   ;;  %s1172_s23 = sshll.u32 %s1801_s26, 3  ;;  %s1255_s25 = sshll.u32 %s1686_s16, 7 }
  0x56   : > { %1619 = vsyncadd (%p1894_p1), [#allocation6], 4294957056  ;;  %v1431_v1 = vld [vmem:[#allocation5] sm:$0xff]   ;;  %1258 = vmatprep.subr.bf16.mxu0 %v1430_v0  ;;  %v1435_v5 = vld [vmem:[#allocation5 + $0x8] sm:$0xff]   ;;  %s201_s4 = scalar_lea.vmem [#allocation7], %s1172_s23  ;;  %s1833_s10 = scalar_lea.hbm %s1880_s3, %s1255_s25 }
  0x57   : > { %v1432_v2 = vld [vmem:[#allocation5 + $0xc0] sm:$0xff]   ;;  %1259 = vmatpush3.bf16.msra.mxu0 %v1431_v1  ;;  %v1436_v6 = vld [vmem:[#allocation5 + $0xc8] sm:$0xff]   ;;  %v1439_v9 = vld [vmem:[#allocation5 + $0x10] sm:$0xff]   ;;  %s1085_s5 = sshll.u32 %s201_s4, 4  ;;  %s1072_s11 = scalar_lea.sflag [#allocation4], %s1801_s26  ;;  %s1835_s5 = int_to_ptr.vmem [resolvable:$true] %s1085_s5 }
  0x58   : > { %v1433_v3 = vld [vmem:[#allocation5 + $0x80] sm:$0xff]   ;;  %1280 = vmatprep.subr.bf16.mxu1 %v1432_v2  ;;  %1260 = vmatprep.subr.bf16.mxu0 %v1434_v4  ;;  %v1437_v7 = vld [vmem:[#allocation5 + $0x88] sm:$0xff]   ;;  %v1440_v10 = vld [vmem:[#allocation5 + $0xd0] sm:$0xff]   ;;  %s1568_s27 = scalar_lea.vmem %s1835_s5, 128  ;;  %s1644_s16 = smov [#allocation7]  }
  0x59   : > { %1281 = vmatpush3.bf16.msra.mxu1 %v1433_v3  ;;  %v1441_v11 = vld [vmem:[#allocation5 + $0x90] sm:$0xff]   ;;  %v1442_v12 = vld [vmem:[#allocation5 + $0x58] sm:$0xff]   ;;  %v1446_v16 = vld [vmem:[#allocation5 + $0x60] sm:$0xff]   ;;  %p1569_p4 = scmp.ne.s32.totalorder %s1835_s5, %s1568_s27  ;;  %s1572_s28 = sshll.u32 %s1644_s16, 4  ;;  %s1573_s28 = int_to_ptr.vmem [resolvable:$false] %s1572_s28 }
  0x5a   : > { %1282 = vmatprep.subr.bf16.mxu1 %v1436_v6  ;;  %v1443_v13 = vld [vmem:[#allocation5 + $0x18] sm:$0xff]   ;;  %v1447_v17 = vld [vmem:[#allocation5 + $0x20] sm:$0xff]   ;;  %v1450_v20 = vld [vmem:[#allocation5 + $0x68] sm:$0xff]   ;;  %s1574_s29 = scalar_lea.vmem %s1573_s28, 256  ;;  %p1575_p10 = scmp.lt.s32.totalorder %s1835_s5, %s1573_s28 }
  0x5b   : > { %1261 = vmatpush3.bf16.msra.mxu0 %v1435_v5  ;;  %v1444_v14 = vld [vmem:[#allocation5 + $0xd8] sm:$0xff]   ;;  %v1448_v18 = vld [vmem:[#allocation5 + $0xe0] sm:$0xff]   ;;  %v1451_v21 = vld [vmem:[#allocation5 + $0x28] sm:$0xff]   ;;  %p1570_p6 = pnand %p1569_p4, %p1756_p12  ;;  %p1576_p11 = scmp.lt.s32.totalorder %s1574_s29, %s1568_s27 }
  0x5c   : > { %1262 = vmatprep.subr.bf16.mxu0 %v1438_v8  ;;  %v1445_v15 = vld [vmem:[#allocation5 + $0x98] sm:$0xff]   ;;  %v1449_v19 = vld [vmem:[#allocation5 + $0xa0] sm:$0xff]   ;;  %v1452_v22 = vld [vmem:[#allocation5 + $0xe8] sm:$0xff]  }
  0x5d   : > { %1283 = vmatpush3.bf16.msra.mxu1 %v1437_v7  ;;  %v1453_v23 = vld [vmem:[#allocation5 + $0xa8] sm:$0xff]   ;;  %v1454_v24 = vld [vmem:[#allocation5 + $0x70] sm:$0xff]   ;;  %v1458_v28 = vld [vmem:[#allocation5 + $0x78] sm:$0xff]   ;;  %p1571_p8 = pneg %p1570_p6  ;;  %p1577_p3 = por %p1576_p11, %p1575_p10 }
  0x5e   : > { %1284 = vmatprep.subr.bf16.mxu1 %v1440_v10  ;;  %v1455_v25 = vld [vmem:[#allocation5 + $0x30] sm:$0xff]   ;;  %v1459_v29 = vld [vmem:[#allocation5 + $0x38] sm:$0xff]   ;;  %v1462_v36 = vld [vmem:[#allocation5 + $0x140] sm:$0xff]  }
  0x5f   : > { %1263 = vmatpush3.bf16.msra.mxu0 %v1439_v9  ;;  %v1456_v26 = vld [vmem:[#allocation5 + $0xf0] sm:$0xff]   ;;  %v1460_v30 = vld [vmem:[#allocation5 + $0xf8] sm:$0xff]   ;;  %v1463_v39 = vld [vmem:[#allocation5 + $0x100] sm:$0xff]   ;;  %p1578_p7 = pnand %p1577_p3, %p1571_p8 }
  0x60   : > { %1264 = vmatprep.subr.bf16.mxu0 %v1442_v12  ;;  %v1457_v27 = vld [vmem:[#allocation5 + $0xb0] sm:$0xff]   ;;  %v204_v31 = vld [vmem:[%s1805_s7 + $0x8] sm:$0xff]  ;;  %v206_v37 = vld [vmem:[%s1805_s7 + $0x18] sm:$0xff] }
  0x61   : > { %1285 = vmatpush3.bf16.msra.mxu1 %v1441_v11  ;;  %v214_v32 = vpack.c.bf16 %v204_v31, %v204_v31  ;;  %v1461_v33 = vld [vmem:[#allocation5 + $0xb8] sm:$0xff]   ;;  %v203_v34 = vld [vmem:[%s1805_s7] sm:$0xff]  ;;  %v216_v38 = vpack.c.bf16 %v206_v37, %v206_v37  ;;  %v205_v40 = vld [vmem:[%s1805_s7 + $0x10] sm:$0xff] }
  0x62   : > { %1286 = vmatprep.subr.bf16.mxu1 %v1444_v14  ;;  %v213_v35 = vpack.c.bf16 %v203_v34, %v203_v34  ;;  %v215_v41 = vpack.c.bf16 %v205_v40, %v205_v40  ;;  %v1464_v42 = vld [vmem:[#allocation5 + $0x1c0] sm:$0xff]   ;;  %v1466_v44 = vld [vmem:[#allocation5 + $0x148] sm:$0xff]   ;;  %v1470_v48 = vld [vmem:[#allocation5 + $0x150] sm:$0xff]  }
  0x63   : > { %1265 = vmatpush3.bf16.msra.mxu0 %v1443_v13  ;;  %902 = vmatprep.mubr.bf16.mxu0 %v214_v32  ;;  %v1465_v43 = vld [vmem:[#allocation5 + $0x180] sm:$0xff]   ;;  %v1467_v45 = vld [vmem:[#allocation5 + $0x108] sm:$0xff]   ;;  %v1471_v49 = vld [vmem:[#allocation5 + $0x110] sm:$0xff]  }
  0x64   : > { %1266 = vmatprep.subr.bf16.mxu0 %v1446_v16  ;;  %942 = vmatprep.mubr.bf16.mxu1 %v216_v38  ;;  %v1468_v46 = vld [vmem:[#allocation5 + $0x1c8] sm:$0xff]   ;;  %v1472_v50 = vld [vmem:[#allocation5 + $0x1d0] sm:$0xff]   ;;  %v1474_v52 = vld [vmem:[#allocation5 + $0x158] sm:$0xff]  }
  0x65   : > { %1287 = vmatpush3.bf16.msra.mxu1 %v1445_v15  ;;  %v1469_v47 = vld [vmem:[#allocation5 + $0x188] sm:$0xff]   ;;  %v1473_v51 = vld [vmem:[#allocation5 + $0x190] sm:$0xff]   ;;  %v1475_v53 = vld [vmem:[#allocation5 + $0x118] sm:$0xff]  }
  0x66   : > { %1288 = vmatprep.subr.bf16.mxu1 %v1448_v18  ;;  %v1476_v54 = vld [vmem:[#allocation5 + $0x1d8] sm:$0xff]   ;;  %v1478_v56 = vld [vmem:[#allocation5 + $0x160] sm:$0xff]   ;;  %v1482_v60 = vld [vmem:[#allocation5 + $0x168] sm:$0xff]  }
  0x67   : > { %1267 = vmatpush3.bf16.msra.mxu0 %v1447_v17  ;;  %v1477_v55 = vld [vmem:[#allocation5 + $0x198] sm:$0xff]   ;;  %v1479_v57 = vld [vmem:[#allocation5 + $0x120] sm:$0xff]   ;;  %v1483_v61 = vld [vmem:[#allocation5 + $0x128] sm:$0xff]  }
  0x68   : > { %1268 = vmatprep.subr.bf16.mxu0 %v1450_v20  ;;  %v1480_v58 = vld [vmem:[#allocation5 + $0x1e0] sm:$0xff]   ;;  %v1484_v62 = vld [vmem:[#allocation5 + $0x1e8] sm:$0xff]   ;;  %v1486_v0 = vld [vmem:[#allocation5 + $0x170] sm:$0xff]  }
  0x69   : > { %1289 = vmatpush3.bf16.msra.mxu1 %v1449_v19  ;;  %v1481_v59 = vld [vmem:[#allocation5 + $0x1a0] sm:$0xff]   ;;  %v1485_v63 = vld [vmem:[#allocation5 + $0x1a8] sm:$0xff]   ;;  %v1487_v1 = vld [vmem:[#allocation5 + $0x130] sm:$0xff]  }
  0x6a   : > { %1290 = vmatprep.subr.bf16.mxu1 %v1452_v22  ;;  %v1488_v2 = vld [vmem:[#allocation5 + $0x1f0] sm:$0xff]   ;;  %v1490_v4 = vld [vmem:[#allocation5 + $0x178] sm:$0xff]   ;;  %v1494_v12 = vld [vmem:[#allocation5 + $0x240] sm:$0xff]  }
  0x6b   : > { %1269 = vmatpush3.bf16.msra.mxu0 %v1451_v21  ;;  %v1489_v3 = vld [vmem:[#allocation5 + $0x1b0] sm:$0xff]   ;;  %v1491_v5 = vld [vmem:[#allocation5 + $0x138] sm:$0xff]   ;;  %v1495_v15 = vld [vmem:[#allocation5 + $0x200] sm:$0xff]  }
  0x6c   : > { %1270 = vmatprep.subr.bf16.mxu0 %v1454_v24  ;;  %v1492_v6 = vld [vmem:[#allocation5 + $0x1f8] sm:$0xff]   ;;  %v207_v10 = vld [vmem:[%s1805_s7 + $0x20] sm:$0xff]  ;;  %v209_v16 = vld [vmem:[%s1805_s7 + $0x30] sm:$0xff] }
  0x6d   : > { %1291 = vmatpush3.bf16.msra.mxu1 %v1453_v23  ;;  %v208_v7 = vld [vmem:[%s1805_s7 + $0x28] sm:$0xff]  ;;  %v217_v11 = vpack.c.bf16 %v207_v10, %v207_v10  ;;  %v210_v13 = vld [vmem:[%s1805_s7 + $0x38] sm:$0xff]  ;;  %v219_v17 = vpack.c.bf16 %v209_v16, %v209_v16  ;;  %v1498_v20 = vld [vmem:[#allocation5 + $0x250] sm:$0xff]  }
  0x6e   : > { %1292 = vmatprep.subr.bf16.mxu1 %v1456_v26  ;;  %v218_v8 = vpack.c.bf16 %v208_v7, %v208_v7  ;;  %v1493_v9 = vld [vmem:[#allocation5 + $0x1b8] sm:$0xff]   ;;  %v220_v14 = vpack.c.bf16 %v210_v13, %v210_v13  ;;  %v1496_v18 = vld [vmem:[#allocation5 + $0x248] sm:$0xff]   ;;  %v1499_v21 = vld [vmem:[#allocation5 + $0x210] sm:$0xff]  }
  0x6f   : > { %1271 = vmatpush3.bf16.msra.mxu0 %v1455_v25  ;;  %v1497_v19 = vld [vmem:[#allocation5 + $0x208] sm:$0xff]   ;;  %v1500_v22 = vld [vmem:[#allocation5 + $0x258] sm:$0xff]   ;;  %v1502_v24 = vld [vmem:[#allocation5 + $0x260] sm:$0xff]  }
  0x70   : > { %1272 = vmatprep.subr.bf16.mxu0 %v1458_v28  ;;  %v1501_v23 = vld [vmem:[#allocation5 + $0x218] sm:$0xff]   ;;  %v1503_v25 = vld [vmem:[#allocation5 + $0x220] sm:$0xff]   ;;  %v1507_v31 = vld [vmem:[#allocation5 + $0x230] sm:$0xff]  }
  0x71   : > { %1293 = vmatpush3.bf16.msra.mxu1 %v1457_v27  ;;  %v212_v26 = vld [vmem:[%s1805_s7 + $0x48] sm:$0xff]  ;;  %v211_v34 = vld [vmem:[%s1805_s7 + $0x40] sm:$0xff] }
  0x72   : > { %1294 = vmatprep.subr.bf16.mxu1 %v1460_v30  ;;  %v1504_v27 = vld [vmem:[#allocation5 + $0x268] sm:$0xff]   ;;  %v222_v28 = vpack.c.bf16 %v212_v26, %v212_v26  ;;  %v1506_v30 = vld [vmem:[#allocation5 + $0x270] sm:$0xff]   ;;  %v1508_v32 = vld [vmem:[#allocation5 + $0x278] sm:$0xff]  }
  0x73   : > { %1273 = vmatpush3.bf16.msra.mxu0 %v1459_v29  ;;  %v1505_v29 = vld [vmem:[#allocation5 + $0x228] sm:$0xff]   ;;  %v1173_v37 = vld [vmem:[%s1879_s2] ss:$0 sm:$0xff] }
  0x74   : > { %1302 = vmatprep.subr.bf16.mxu0 %v1462_v36 }
  0x75   : > { %1295 = vmatpush3.bf16.msra.mxu1 %v1461_v33  ;;  %v1509_v33 = vld [vmem:[#allocation5 + $0x238] sm:$0xff]  }
  0x76   : > { %903 = vmatmul.mubr.bf16.vlgmr.msra.gmra.mrb[0].mxu0 %v213_v35  ;;  %1324 = vmatprep.subr.bf16.mxu1 %v1464_v42  ;;  %v221_v35 = vpack.c.bf16 %v211_v34, %v211_v34 }
  0x77   : > { %1303 = vmatpush3.bf16.msra.mxu0 %v1463_v39  ;;  %982 = vmatprep.mubr.bf16.mxu0 %v218_v8 }
  0x78   : > { %943 = vmatmul.mubr.bf16.vlgmr.msra.gmra.mrb[0].mxu1 %v215_v41  ;;  %1304 = vmatprep.subr.bf16.mxu0 %v1466_v44 }
  0x79   : > { %1325 = vmatpush3.bf16.msra.mxu1 %v1465_v43  ;;  %1022 = vmatprep.mubr.bf16.mxu1 %v220_v14 }
  0x7a   : > { %1326 = vmatprep.subr.bf16.mxu1 %v1468_v46 }
  0x7b   : > { %1305 = vmatpush3.bf16.msra.mxu0 %v1467_v45 }
  0x7c   : > { %1306 = vmatprep.subr.bf16.mxu0 %v1470_v48 }
  0x7d   : > { %1327 = vmatpush3.bf16.msra.mxu1 %v1469_v47 }
  0x7e   : > { %1328 = vmatprep.subr.bf16.mxu1 %v1472_v50 }
  0x7f   : > { %1307 = vmatpush3.bf16.msra.mxu0 %v1471_v49 }
  0x80   : > { %1308 = vmatprep.subr.bf16.mxu0 %v1474_v52 }
  0x81   : > { %1329 = vmatpush3.bf16.msra.mxu1 %v1473_v51 }
  0x82   : > { %1330 = vmatprep.subr.bf16.mxu1 %v1476_v54 }
  0x83   : > { %1309 = vmatpush3.bf16.msra.mxu0 %v1475_v53 }
  0x84   : > { %1310 = vmatprep.subr.bf16.mxu0 %v1478_v56 }
  0x85   : > { %1331 = vmatpush3.bf16.msra.mxu1 %v1477_v55 }
  0x86   : > { %1332 = vmatprep.subr.bf16.mxu1 %v1480_v58 }
  0x87   : > { %1311 = vmatpush3.bf16.msra.mxu0 %v1479_v57 }
  0x88   : > { %1312 = vmatprep.subr.bf16.mxu0 %v1482_v60 }
  0x89   : > { %1333 = vmatpush3.bf16.msra.mxu1 %v1481_v59 }
  0x8a   : > { %1334 = vmatprep.subr.bf16.mxu1 %v1484_v62 }
  0x8b   : > { %1313 = vmatpush3.bf16.msra.mxu0 %v1483_v61 }
  0x8c   : > { %1314 = vmatprep.subr.bf16.mxu0 %v1486_v0 }
  0x8d   : > { %1335 = vmatpush3.bf16.msra.mxu1 %v1485_v63 }
  0x8e   : > { %1336 = vmatprep.subr.bf16.mxu1 %v1488_v2 }
  0x8f   : > { %1315 = vmatpush3.bf16.msra.mxu0 %v1487_v1 }
  0x90   : > { %1316 = vmatprep.subr.bf16.mxu0 %v1490_v4 }
  0x91   : > { %1337 = vmatpush3.bf16.msra.mxu1 %v1489_v3 }
  0x92   : > { %1338 = vmatprep.subr.bf16.mxu1 %v1492_v6 }
  0x93   : > { %1317 = vmatpush3.bf16.msra.mxu0 %v1491_v5 }
  0x94   : > { %1346 = vmatprep.subr.bf16.mxu0 %v1494_v12 }
  0x95   : > { %1339 = vmatpush3.bf16.msra.mxu1 %v1493_v9 }
  0x96   : > { %983 = vmatmul.mubr.bf16.vlgmr.msra.gmra.mrb[4].mxu0 %v217_v11 }
  0x97   : > { %1347 = vmatpush3.bf16.msra.mxu0 %v1495_v15  ;;  %1062 = vmatprep.mubr.bf16.mxu0 %v222_v28 }
  0x98   : > { %1023 = vmatmul.mubr.bf16.vlgmr.msra.gmra.mrb[4].mxu1 %v219_v17  ;;  %1348 = vmatprep.subr.bf16.mxu0 %v1496_v18 }
  0x9b   : > { %1349 = vmatpush3.bf16.msra.mxu0 %v1497_v19 }
  0x9c   : > { %1350 = vmatprep.subr.bf16.mxu0 %v1498_v20 }
  0x9f   : > { %1351 = vmatpush3.bf16.msra.mxu0 %v1499_v21 }
  0xa0   : > { %1352 = vmatprep.subr.bf16.mxu0 %v1500_v22 }
  0xa3   : > { %1353 = vmatpush3.bf16.msra.mxu0 %v1501_v23 }
  0xa4   : > { %1354 = vmatprep.subr.bf16.mxu0 %v1502_v24 }
  0xa7   : > { %1355 = vmatpush3.bf16.msra.mxu0 %v1503_v25 }
  0xa8   : > { %1356 = vmatprep.subr.bf16.mxu0 %v1504_v27 }
  0xab   : > { %1357 = vmatpush3.bf16.msra.mxu0 %v1505_v29 }
  0xac   : > { %1358 = vmatprep.subr.bf16.mxu0 %v1506_v30 }
  0xaf   : > { %1359 = vmatpush3.bf16.msra.mxu0 %v1507_v31 }
  0xb0   : > { %1360 = vmatprep.subr.bf16.mxu0 %v1508_v32 }
  0xb3   : > { %1361 = vmatpush3.bf16.msra.mxu0 %v1509_v33 }
  0xb6   : > { %1063 = vmatmul.mubr.bf16.vlgmr.msra.gmra.mrb[8].mxu0 %v221_v35 }
 0x149   : > { %v1274_v36 = vpop.f32.mrb[0].mxu0 }
 0x14a   : > { %v1275_v38 = vpop.f32.mrb[1].mxu0 }
 0x14b   : > { %v1276_v39 = vadd.f32 %v1275_v38, %v1274_v36  ;;  %v1277_v40 = vpop.f32.mrb[2].mxu0  ;;  %v1296_v41 = vpop.f32.mrb[0].mxu1 }
 0x14c   : > { %v1278_v42 = vpop.f32.mrb[3].mxu0  ;;  %v1297_v44 = vpop.f32.mrb[1].mxu1 }
 0x14d   : > { %v905_v43 = vadd.f32 %v1276_v39, %v1173_v37  ;;  %v1298_v45 = vadd.f32 %v1297_v44, %v1296_v41  ;;  %v1299_v46 = vpop.f32.mrb[2].mxu1 }
 0x14e   : > { %v1300_v47 = vpop.f32.mrb[3].mxu1 }
 0x14f   : > { %v945_v48 = vadd.f32 %v1298_v45, %v905_v43 }
 0x169   : > { %v1318_v49 = vpop.f32.mrb[4].mxu0 }
 0x16a   : > { %v1319_v50 = vpop.f32.mrb[5].mxu0 }
 0x16b   : > { %v1320_v51 = vadd.f32 %v1319_v50, %v1318_v49  ;;  %v1321_v52 = vpop.f32.mrb[6].mxu0  ;;  %v1340_v53 = vpop.f32.mrb[4].mxu1 }
 0x16c   : > { %v1322_v54 = vpop.f32.mrb[7].mxu0  ;;  %v1341_v56 = vpop.f32.mrb[5].mxu1 }
 0x16d   : > { %v985_v55 = vadd.f32 %v1320_v51, %v945_v48  ;;  %v1342_v57 = vadd.f32 %v1341_v56, %v1340_v53  ;;  %v1343_v58 = vpop.f32.mrb[6].mxu1 }
 0x16e   : > { %v1344_v59 = vpop.f32.mrb[7].mxu1 }
 0x16f   : > { %v1025_v60 = vadd.f32 %v1342_v57, %v985_v55 }
 0x189   : > { %v1362_v61 = vpop.f32.mrb[8].mxu0 }
 0x18a   : > { %v1363_v62 = vpop.f32.mrb[9].mxu0 }
 0x18b   : > { %v1364_v63 = vadd.f32 %v1363_v62, %v1362_v61  ;;  %v1365_v0 = vpop.f32.mrb[10].mxu0 }
 0x18c   : > { %v1366_v1 = vpop.f32.mrb[11].mxu0 }
 0x18d   : > { %v1065_v2 = vadd.f32 %v1364_v63, %v1025_v60 }
 0x18f   : > { %1070 = vst [vmem:[%s201_s4] sm:$0xff] %v1065_v2 }
 0x190   : > { %1581 = shalt.err (!%p1578_p7)
}
 0x191   : > { %s1582_s22 = scalar_lea.hbm %s1833_s10, 128  ;;  %s1586_s6 = scalar_lea.hbm %s1880_s3, 256 }
 0x192   : > { %p1583_p9 = scmp.ne.s32.totalorder %s1833_s10, %s1582_s22  ;;  %p1587_p0 = scmp.lt.u32.totalorder %s1833_s10, %s1880_s3 }
 0x193   : > { %p1588_p13 = scmp.lt.u32.totalorder %s1586_s6, %s1582_s22  ;;  %p1590_p4 = scmp.lt.u32.totalorder %s1582_s22, %s1833_s10 }
 0x194   : > { %p1584_p2 = pnand %p1583_p9, %p1756_p12 }
 0x195   : > { %p1589_p1 = por %p1588_p13, %p1587_p0 }
 0x196   : > { %p1585_p5 = pneg %p1584_p2 }
 0x197   : > { %p1591_p6 = por %p1590_p4, %p1589_p1 }
 0x199   : > { %p1592_p8 = pnand %p1591_p6, %p1585_p5 }
 0x19b   : > { %1595 = shalt.err (!%p1592_p8)
}
 0x19c   : > { %1377 = dma.vmem_to_hbm [thread:$0]  (%p1756_p12), %s1835_s5, 128, %s1833_s10, %s1072_s11  }
 0x19d PF: > { %s1097_s20 = sand.u32 1, %s1626_s12   ;;  %p1895_p10 = scmp.ne.s32.totalorder %s1885_s19, 0 }
 0x19e   : > { %p1896_p11 = scmp.ge.s32.totalorder %s1638_s15, 2  ;;  %s1098_s23 = scalar_lea.sflag [#allocation4], %s1097_s20 }
 0x1a0   : > { %p1388_p3 = pnand %p1896_p11, %p1895_p10 }
 0x1a2   : > { %1621 = dma.done.wait (!%p1388_p3), %s1098_s23, 128  }
 0x1a3   : > { %1623 = vsyncadd (!%p1388_p3), %s1098_s23, 4294967168  ;;  %p17_p7 = scmp.ge.s32.totalorder %s1721_s24, 4   ;;  %s1897_s12 = smov %s1630_s13 }
 0x1a4   : > { %s1898_s13 = smov %s1634_s14  ;;  %s1899_s14 = smov %s1752_s17 }
 0x1a5   : > { %s1900_s15 = smov %s1721_s24  ;;  %19 = sbr.rel (!%p17_p7) target bundleno = 6 (0x6), region = 81 }
 0x1ac   :  { %1103 = vsyncpa [#allocation3], 1 }
 0x1ad   :  { %1105 = vsyncpa [#allocation3 + $0x1], 1 }
 0x1ae   :  { %1106 = vsyncpa [#allocation6], 1 }
 0x1af   :  { %1107 = vsyncpa [#allocation4], 1 }
 0x1b0   :  { %1109 = vsyncpa [#allocation4 + $0x1], 1 }

</bundles_post_ra>
